<compile_context>
chip_gen: v7x
topology: tpu7x:2x2x1
jax: 0.10.0
libtpu: 0.0.40
codegen_flags: <defaults>
</compile_context>

<pallas_src>
import numpy as np
import jax
import jax.numpy as jnp
from jax import lax
from jax.experimental import pallas as pl
from jax.experimental.pallas import tpu as pltpu

HIDDEN = 32
LANE = 128


def _round_up(x, m):
    return -(-x // m) * m


def _cdiv(a, b):
    return -(-a // b)


# ----------------------------- Pallas kernel --------------------------------
def _mean_pool_kernel(x_ref, inv_ref, o_ref):
    # x_ref: (T, BR, 128) input dtype (f32 or bf16), invalid subword slots are
    #        already zero.  inv_ref / o_ref: (BR, 128) f32.
    # Accumulate straight into the VMEM output block (bounded vreg pressure for
    # any BR), then scale by the precomputed reciprocal subword counts.
    t_extent = x_ref.shape[0]
    o_ref[...] = x_ref[0].astype(jnp.float32)
    if t_extent > 1:
        def body(t, carry):
            o_ref[...] += x_ref[t].astype(jnp.float32)
            return carry
        lax.fori_loop(1, t_extent, body, 0,
                      unroll=True if t_extent <= 16 else 8)
    o_ref[...] = o_ref[...] * inv_ref[...]


def _tpu_budget():
    """(working_set_cap, max block rows, force >=2 blocks, vmem_limit cap)."""
    vmem_bytes = None
    try:
        vmem_bytes = int(pltpu.get_tpu_info().vmem_capacity_bytes)
    except Exception:
        try:
            if "v7" in jax.devices()[0].device_kind.lower():
                vmem_bytes = 64 << 20
        except Exception:
            pass
    if vmem_bytes is None:
        vmem_bytes = 64 << 20                       # assume smallest (v7x-safe)
    if vmem_bytes <= (64 << 20):                    # v7x: 64 MiB/TC, 2 TCs
        return 24 << 20, 512, True, 32 << 20
    return 48 << 20, 1024, False, 64 << 20          # v5e/v6e: 128 MiB, 1 TC


def pooled_subword_mean(flat, src, inv_len, hidden_size):
    """Masked mean over the subword axis, lane-packed.

    flat:    (n_flat, H) device activations
    src:     (wc, tmax)  numpy flat-row indices; out-of-range => zero slot
    inv_len: (wc,)       numpy reciprocal subword counts (0 for padding rows)
    returns: (wc, H)     f32 pooled vectors
    """
    wc, tmax = src.shape
    H = hidden_size
    if wc == 0 or tmax == 0:
        return jnp.zeros((wc, H), jnp.float32)

    # Lane-dense packing: group = 128 // H consecutive rows share one vreg row,
    # so every store is a full unmasked (sub, 128) tile.
    # TODO(synk): general H that does not divide 128 needs a padded-H fallback.
    assert LANE % H == 0, "hidden size must divide 128 for the lane-packed path"
    group = LANE // H

    x_itemsize = jnp.dtype(flat.dtype).itemsize
    sub = 8 if x_itemsize >= 4 else 16              # sublane tile granularity
    cap, br_max, force_two, vmem_cap = _tpu_budget()

    w4 = _cdiv(wc, group)                           # rows in lane-packed layout
    w4a = _round_up(w4, sub)

    # Block-row budget: double-buffered (x slab + inv + out) per block row.
    bytes_per_row = 2 * (tmax * LANE * x_itemsize + 2 * LANE * 4)
    br_budget = max(sub, (cap // bytes_per_row) // sub * sub)
    br_cap = int(min(br_max, br_budget))

    nb = _cdiv(w4a, br_cap)
    if force_two and nb == 1 and w4a >= 2 * sub:
        nb = 2                                      # keep both v7x TCs busy
    br = _round_up(_cdiv(w4a, nb), sub)             # balanced blocks, low padding
    nb = _cdiv(w4a, br)
    w4p = nb * br
    wp = w4p * group

    # Host-side (numpy) layout fusion: transposed + padded index map and the
    # ready-to-use reciprocal-length plane.  No device pad/transpose/astype.
    n_flat = flat.shape[0]
    src_t = np.full((tmax, wp), n_flat, np.int64)   # n_flat == OOB -> fill 0
    src_t[:, :wc] = src.T
    invp = np.zeros((wp,), np.float32)
    invp[:wc] = np.asarray(inv_len, np.float32)
    invg = np.repeat(invp.reshape(w4p, group), H, axis=1)       # (w4p, 128)

    # One gather straight into the lane-packed (tmax, w4p, 128) layout.
    xg = jnp.take(flat, jnp.asarray(src_t, jnp.int32), axis=0,
                  mode="fill", fill_value=0)
    xg = xg.reshape(tmax, w4p, LANE)                # free trailing-dim merge

    footprint = 2 * br * (tmax * LANE * x_itemsize + 2 * LANE * 4)
    out = pl.pallas_call(
        _mean_pool_kernel,
        out_shape=jax.ShapeDtypeStruct((w4p, LANE), jnp.float32),
        grid=(nb,),
        in_specs=[
            pl.BlockSpec((tmax, br, LANE), lambda i: (0, i, 0)),
            pl.BlockSpec((br, LANE), lambda i: (i, 0)),
        ],
        out_specs=pl.BlockSpec((br, LANE), lambda i: (i, 0)),
        compiler_params=pltpu.CompilerParams(
            dimension_semantics=("parallel",),
            vmem_limit_bytes=int(min(vmem_cap, max(4 << 20, 2 * footprint))),
        ),
    )(xg, jnp.asarray(invg))
    return out.reshape(wp, H)[:wc]


# --------------------------- SubwordAggregation ------------------------------
# torch masked_select / masked_scatter_ with the mask expanded over hidden are
# row-level gather/scatter in rank order.  Masks are concrete (numpy) metadata,
# so the whole chain collapses into host-side index maps + device gathers.
# TODO(synk): the row gathers could be pulled into the kernel via
# PrefetchScalarGridSpec, but per-row DMAs would reintroduce per-step overhead
# at these sizes, so they stay as single fused XLA gathers.
def subword_aggregation(inputs, batch, hidden_size=HIDDEN):
    bs, seq, _ = inputs.shape
    n_flat = bs * seq

    word_mask = np.asarray(batch["word_mask"], bool)
    number_mask = np.asarray(batch["number_mask"], bool)
    wsm = np.asarray(batch["word_subword_mask"], bool)
    nsm = np.asarray(batch["number_subword_mask"], bool)
    w_lens = np.asarray(batch["word_subword_lens"])
    n_lens = np.asarray(batch["number_subword_lens"])

    ww, tw = wsm.shape
    wn, tn = nsm.shape
    tmax = max(tw, tn)
    wc = ww + wn

    # ---- host-side index composition ---------------------------------------
    # (word-or-number row, subword slot) -> flat row of `inputs`
    # (n_flat == out-of-range == "use zero").
    src = np.full((wc, tmax), n_flat, np.int64)
    src[:ww, :tw][wsm] = np.flatnonzero(word_mask)
    src[ww:, :tn][nsm] = np.flatnonzero(number_mask)

    lens = np.concatenate([w_lens, n_lens]).astype(np.float32)
    inv_len = np.where(lens > 0, 1.0 / np.maximum(lens, 1.0), 0.0).astype(np.float32)

    # word-level token -> pooled row index (wc == out-of-range == "use zero")
    b_word = np.asarray(batch["b_word_word_mask"], bool)
    b_number = np.asarray(batch["b_number_word_mask"], bool)
    ni_src = np.full((b_word.shape[0],), wc, np.int64)
    ni_src[b_word] = np.arange(ww)
    ni_src[b_number] = ww + np.arange(wn)

    pl_b = np.asarray(batch["pl_mask"]["b"], bool)
    wl_src = np.full(pl_b.shape, wc, np.int64)
    wl_src[pl_b] = ni_src

    def dest_index(sel_mask, out_mask, max_len_):
        picked = wl_src[np.asarray(sel_mask, bool)]
        dst = np.full((bs, int(max_len_)), wc, np.int64)
        dst[np.asarray(out_mask, bool)] = picked
        return jnp.asarray(dst, jnp.int32)

    q_src = dest_index(batch["pl_mask"]["q"], batch["pl_mask"]["question"],
                       batch["max_len"]["question"])
    t_src = dest_index(batch["pl_mask"]["t"], batch["pl_mask"]["table"],
                       batch["max_len"]["table_word"])
    p_src = dest_index(batch["pl_mask"]["p"], batch["pl_mask"]["paragraph"],
                       batch["max_len"]["paragraph"])

    # ---- device side: one gather -> one Pallas kernel -> three gathers ------
    flat = inputs.reshape(n_flat, hidden_size)
    pooled = pooled_subword_mean(flat, src, inv_len, hidden_size)   # (wc, H)

    questions = jnp.take(pooled, q_src, axis=0, mode="fill", fill_value=0.0)
    tables = jnp.take(pooled, t_src, axis=0, mode="fill", fill_value=0.0)
    paragraphs = jnp.take(pooled, p_src, axis=0, mode="fill", fill_value=0.0)
    return questions, tables, paragraphs


# -------------------- numpy reference (torch-like semantics) -----------------
def reference_forward(inputs_np, batch, hidden_size=HIDDEN):
    bs = inputs_np.shape[0]
    flat = inputs_np.reshape(-1, hidden_size)
    word_mask = np.asarray(batch["word_mask"], bool)
    number_mask = np.asarray(batch["number_mask"], bool)
    wsm = np.asarray(batch["word_subword_mask"], bool)
    nsm = np.asarray(batch["number_subword_mask"], bool)

    old_word = flat[word_mask.reshape(-1)]
    old_number = flat[number_mask.reshape(-1)]
    words = np.zeros((wsm.shape[0], wsm.shape[1], hidden_size), np.float32)
    words[wsm] = old_word
    numbers = np.zeros((nsm.shape[0], nsm.shape[1], hidden_size), np.float32)
    numbers[nsm] = old_number

    def pool(x, m):
        mf = m.astype(np.float32)[..., None]
        return (x * mf).sum(1) / mf.sum(1)

    words = pool(words, wsm)
    numbers = pool(numbers, nsm)

    b_word = np.asarray(batch["b_word_word_mask"], bool)
    b_number = np.asarray(batch["b_number_word_mask"], bool)
    new_inputs = np.zeros((b_word.shape[0], hidden_size), np.float32)
    new_inputs[b_word] = words
    new_inputs[b_number] = numbers

    pl_b = np.asarray(batch["pl_mask"]["b"], bool)
    word_level = np.zeros((bs, pl_b.shape[1], hidden_size), np.float32)
    word_level[pl_b] = new_inputs

    oq = word_level[np.asarray(batch["pl_mask"]["q"], bool)]
    ot = word_level[np.asarray(batch["pl_mask"]["t"], bool)]
    op = word_level[np.asarray(batch["pl_mask"]["p"], bool)]

    q = np.zeros((bs, batch["max_len"]["question"], hidden_size), np.float32)
    q[np.asarray(batch["pl_mask"]["question"], bool)] = oq
    t = np.zeros((bs, batch["max_len"]["table_word"], hidden_size), np.float32)
    t[np.asarray(batch["pl_mask"]["table"], bool)] = ot
    p = np.zeros((bs, batch["max_len"]["paragraph"], hidden_size), np.float32)
    p[np.asarray(batch["pl_mask"]["paragraph"], bool)] = op
    return q, t, p


# --------------------------------- main --------------------------------------
if __name__ == "__main__":
    bs, seq, H = 2, 16, HIDDEN
    key = jax.random.PRNGKey(0)
    inputs = jax.random.normal(key, (bs, seq, H), dtype=jnp.float32)

    # Subword-level masks (consistent synthetic metadata).
    word_mask = np.zeros((bs, seq), bool)
    number_mask = np.zeros((bs, seq), bool)
    word_mask[0, [1, 2, 3, 4, 5, 6, 7, 10, 11, 12]] = True
    number_mask[0, [8, 9, 13, 14]] = True
    word_mask[1, [1, 2, 3, 4, 7, 8, 9]] = True
    number_mask[1, [5, 6, 10, 11, 12]] = True

    word_subword_lens = np.array([2, 1, 3, 1, 1, 2, 1, 3, 1, 2], np.int32)   # 10 words
    number_subword_lens = np.array([2, 1, 1, 1, 1, 3], np.int32)             # 6 numbers

    def lens_to_mask(lens):
        maxlen = int(lens.max())
        return np.arange(maxlen)[None, :] < lens[:, None]

    word_subword_mask = lens_to_mask(word_subword_lens)
    number_subword_mask = lens_to_mask(number_subword_lens)

    # Word-level token types per batch (flattened over actual word-level tokens).
    types_b0 = ["w", "w", "w", "w", "n", "w", "w", "n", "n"]   # 9 tokens
    types_b1 = ["w", "w", "n", "n", "w", "w", "n"]             # 7 tokens
    flat_types = types_b0 + types_b1
    b_word_word_mask = np.array([t == "w" for t in flat_types])
    b_number_word_mask = np.array([t == "n" for t in flat_types])

    L_b = 10
    pl_b = np.zeros((bs, L_b), bool)
    pl_b[0, :len(types_b0)] = True
    pl_b[1, :len(types_b1)] = True

    pl_q = np.zeros((bs, L_b), bool); pl_q[0, 0:3] = True; pl_q[1, 0:2] = True
    pl_t = np.zeros((bs, L_b), bool); pl_t[0, 3:6] = True; pl_t[1, 2:5] = True
    pl_p = np.zeros((bs, L_b), bool); pl_p[0, 6:9] = True; pl_p[1, 5:7] = True

    pl_question = np.array([[1, 1, 1], [1, 1, 0]], bool)
    pl_table = np.array([[1, 1, 1], [1, 1, 1]], bool)
    pl_paragraph = np.array([[1, 1, 1], [1, 1, 0]], bool)

    batch = {
        "word_mask": word_mask,
        "number_mask": number_mask,
        "word_subword_lens": word_subword_lens,
        "number_subword_lens": number_subword_lens,
        "word_subword_mask": word_subword_mask,
        "number_subword_mask": number_subword_mask,
        "b_word_word_mask": b_word_word_mask,
        "b_number_word_mask": b_number_word_mask,
        "pl_mask": {
            "b": pl_b, "q": pl_q, "t": pl_t, "p": pl_p,
            "question": pl_question, "table": pl_table, "paragraph": pl_paragraph,
        },
        "max_len": {"question": 3, "table_word": 3, "paragraph": 3},
    }

    q, t, p = subword_aggregation(inputs, batch)
    q = jax.block_until_ready(q)
    t = jax.block_until_ready(t)
    p = jax.block_until_ready(p)

    # Reference implementing the original masked_select / masked_scatter_ chain.
    q_ref, t_ref, p_ref = reference_forward(np.asarray(inputs), batch)
    np.testing.assert_allclose(np.asarray(q), q_ref, rtol=1e-5, atol=1e-5)
    np.testing.assert_allclose(np.asarray(t), t_ref, rtol=1e-5, atol=1e-5)
    np.testing.assert_allclose(np.asarray(p), p_ref, rtol=1e-5, atol=1e-5)

    print("KERNEL_OK")
</pallas_src>

<mosaic_0001>
module attributes {stable_mosaic.version = 11 : i64} {
  func.func @_mean_pool_kernel(%arg0: i32, %arg1: memref<3x8x128xf32, #tpu.memory_space<vmem>>, %arg2: memref<8x128xf32, #tpu.memory_space<vmem>>, %arg3: memref<8x128xf32, #tpu.memory_space<vmem>>) attributes {dimension_semantics = [#tpu.dimension_semantics<parallel>], iteration_bounds = array<i64: 1>, scalar_prefetch = 0 : i64, scratch_operands = 0 : i64, tpu.core_type = #tpu.core_type<tc>, window_params = [{transform_indices = @transform_0, window_bounds = array<i64: 3, 8, 128>}, {transform_indices = @transform_1, window_bounds = array<i64: 8, 128>}, {transform_indices = @transform_2, window_bounds = array<i64: 8, 128>}]} {
    %c0 = arith.constant 0 : index
    %c0_0 = arith.constant 0 : index
    %c0_1 = arith.constant 0 : index
    %0 = vector.load %arg1[%c0, %c0_0, %c0_1] : memref<3x8x128xf32, #tpu.memory_space<vmem>>, vector<1x8x128xf32>
    %1 = vector.shape_cast %0 : vector<1x8x128xf32> to vector<8x128xf32>
    %c0_2 = arith.constant 0 : index
    %c0_3 = arith.constant 0 : index
    %2 = vector.load %arg3[%c0_2, %c0_3] : memref<8x128xf32, #tpu.memory_space<vmem>>, vector<8x128xf32>
    tpu.vector_store %arg3[%c0_2, %c0_3], %1 {strides = array<i32>} : memref<8x128xf32, #tpu.memory_space<vmem>>, vector<8x128xf32>,
    %c1_i32 = arith.constant 1 : i32
    %c0_4 = arith.constant 0 : index
    %c0_5 = arith.constant 0 : index
    %3 = vector.load %arg3[%c0_4, %c0_5] : memref<8x128xf32, #tpu.memory_space<vmem>>, vector<8x128xf32>
    %4 = arith.index_cast %c1_i32 : i32 to index
    %c0_6 = arith.constant 0 : index
    %c0_7 = arith.constant 0 : index
    %5 = vector.load %arg1[%4, %c0_6, %c0_7] : memref<3x8x128xf32, #tpu.memory_space<vmem>>, vector<1x8x128xf32>
    %6 = vector.shape_cast %5 : vector<1x8x128xf32> to vector<8x128xf32>
    %7 = arith.addf %3, %6 : vector<8x128xf32>
    %c0_8 = arith.constant 0 : index
    %c0_9 = arith.constant 0 : index
    %8 = vector.load %arg3[%c0_8, %c0_9] : memref<8x128xf32, #tpu.memory_space<vmem>>, vector<8x128xf32>
    tpu.vector_store %arg3[%c0_8, %c0_9], %7 {strides = array<i32>} : memref<8x128xf32, #tpu.memory_space<vmem>>, vector<8x128xf32>,
    %c2_i32 = arith.constant 2 : i32
    %c0_10 = arith.constant 0 : index
    %c0_11 = arith.constant 0 : index
    %9 = vector.load %arg3[%c0_10, %c0_11] : memref<8x128xf32, #tpu.memory_space<vmem>>, vector<8x128xf32>
    %10 = arith.index_cast %c2_i32 : i32 to index
    %c0_12 = arith.constant 0 : index
    %c0_13 = arith.constant 0 : index
    %11 = vector.load %arg1[%10, %c0_12, %c0_13] : memref<3x8x128xf32, #tpu.memory_space<vmem>>, vector<1x8x128xf32>
    %12 = vector.shape_cast %11 : vector<1x8x128xf32> to vector<8x128xf32>
    %13 = arith.addf %9, %12 : vector<8x128xf32>
    %c0_14 = arith.constant 0 : index
    %c0_15 = arith.constant 0 : index
    %14 = vector.load %arg3[%c0_14, %c0_15] : memref<8x128xf32, #tpu.memory_space<vmem>>, vector<8x128xf32>
    tpu.vector_store %arg3[%c0_14, %c0_15], %13 {strides = array<i32>} : memref<8x128xf32, #tpu.memory_space<vmem>>, vector<8x128xf32>,
    %c2_i32_16 = arith.constant 2 : i32
    %c0_17 = arith.constant 0 : index
    %c0_18 = arith.constant 0 : index
    %15 = vector.load %arg3[%c0_17, %c0_18] : memref<8x128xf32, #tpu.memory_space<vmem>>, vector<8x128xf32>
    %c0_19 = arith.constant 0 : index
    %c0_20 = arith.constant 0 : index
    %16 = vector.load %arg2[%c0_19, %c0_20] : memref<8x128xf32, #tpu.memory_space<vmem>>, vector<8x128xf32>
    %17 = arith.mulf %15, %16 : vector<8x128xf32>
    %c0_21 = arith.constant 0 : index
    %c0_22 = arith.constant 0 : index
    %18 = vector.load %arg3[%c0_21, %c0_22] : memref<8x128xf32, #tpu.memory_space<vmem>>, vector<8x128xf32>
    tpu.vector_store %arg3[%c0_21, %c0_22], %17 {strides = array<i32>} : memref<8x128xf32, #tpu.memory_space<vmem>>, vector<8x128xf32>,
    return
  }
  func.func @transform_0(%arg0: i32) -> (i32, i32, i32) {
    %c0_i32 = arith.constant 0 : i32
    %c0_i32_0 = arith.constant 0 : i32
    %c0_i32_1 = arith.constant 0 : i32
    return %c0_i32, %arg0, %c0_i32_0 : i32, i32, i32
  }
  func.func @transform_1(%arg0: i32) -> (i32, i32) {
    %c0_i32 = arith.constant 0 : i32
    %c0_i32_0 = arith.constant 0 : i32
    return %arg0, %c0_i32 : i32, i32
  }
  func.func @transform_2(%arg0: i32) -> (i32, i32) {
    %c0_i32 = arith.constant 0 : i32
    %c0_i32_0 = arith.constant 0 : i32
    return %arg0, %c0_i32 : i32, i32
  }
}

</mosaic_0001>

<bundles_post_ra>
// kernel: tpu_custom_call.1
= control target key start
LH: loop header
LB: loop body
LE: loop exit
PB: predicated region body
PF: predicated region fallthrough
CT: control target
= control target key end

     0   :  { %7 = vsyncpa [#allocation3], 0  ;;  %s203_s0 = inlined_call_operand.hbm [shape: f32[3,8,128], index: 0, kind: input, shape index: {}]   ;;  %s204_s1 = inlined_call_operand.hbm [shape: f32[8,128], index: 1, kind: input, shape index: {}]   ;;  %s205_s2 = inlined_call_operand.hbm [shape: f32[8,128], index: 2, kind: output, shape index: {}]  }
   0x1   :  { %8 = vsyncpa [#allocation6], 0 }
   0x2   :  { %9 = vsyncpa [#allocation4], 0  ;;  %s147_s9 = smov [#allocation2]   ;;  %s75_s13 = scalar_lea.hbm %s203_s0, 384 }
   0x3   :  { %s15_s10 = sshll.u32 %s147_s9, 4  ;;  %p76_p0 = scmp.ne.s32.totalorder %s203_s0, %s75_s13  ;;  %s16_s10 = int_to_ptr.vmem [resolvable:$true] %s15_s10 }
   0x4   :  { %p79_p1 = scmp.lt.u32.totalorder %s75_s13, %s203_s0 }
   0x6   :  { %p81_p2 = pnand %p79_p1, %p76_p0 }
   0x8   :  { %84 = shalt.err (!%p81_p2)
}
   0x9   :  { %s85_s18 = scalar_lea.vmem %s16_s10, 384  ;;  %p90_p4 = scmp.lt.s32.totalorder %s16_s10, %s16_s10 }
   0xa   :  { %p86_p3 = scmp.ne.s32.totalorder %s16_s10, %s85_s18  ;;  %p91_p5 = scmp.lt.s32.totalorder %s85_s18, %s85_s18 }
   0xc   :  { %p92_p6 = por %p91_p5, %p90_p4 }
   0xe   :  { %p93_p7 = pnand %p92_p6, %p86_p3 }
  0x10   :  { %96 = shalt.err (!%p93_p7)
}
  0x11   :  { %s148_s19 = smov 128   ;;  %s149_s20 = smov 8  }
  0x12   :  { %21 = dma.hbm_to_vmem [thread:$0]  %s203_s0, 384, %s16_s10, [#allocation3], %s148_s19, %s148_s19, %s149_s20  }
  0x13   :  { %s150_s23 = smov [#allocation5]   ;;  %s97_s27 = scalar_lea.hbm %s204_s1, 128 }
  0x14   :  { %s28_s24 = sshll.u32 %s150_s23, 4  ;;  %p98_p8 = scmp.ne.s32.totalorder %s204_s1, %s97_s27  ;;  %s29_s24 = int_to_ptr.vmem [resolvable:$true] %s28_s24 }
  0x15   :  { %p101_p9 = scmp.lt.u32.totalorder %s97_s27, %s204_s1 }
  0x17   :  { %p103_p10 = pnand %p101_p9, %p98_p8 }
  0x19   :  { %106 = shalt.err (!%p103_p10)
}
  0x1a   :  { %s107_s4 = scalar_lea.vmem %s29_s24, 128  ;;  %p112_p12 = scmp.lt.s32.totalorder %s29_s24, %s29_s24 }
  0x1b   :  { %p108_p11 = scmp.ne.s32.totalorder %s29_s24, %s107_s4  ;;  %p113_p13 = scmp.lt.s32.totalorder %s107_s4, %s107_s4 }
  0x1d   :  { %p114_p0 = por %p113_p13, %p112_p12 }
  0x1f   :  { %p115_p1 = pnand %p114_p0, %p108_p11 }
  0x21   :  { %118 = shalt.err (!%p115_p1)
}
  0x22   :  { %31 = dma.hbm_to_vmem [thread:$0]  %s204_s1, 128, %s29_s24, [#allocation6]  }
  0x23   :  { %141 = dma.done.wait [#allocation3], 384  }
  0x24   :  { %142 = vsyncadd [#allocation3], 4294966912 }
  0x25   :  { %143 = dma.done.wait [#allocation6], 128  }
  0x26   :  { %144 = vsyncadd [#allocation6], 4294967168  ;;  %v38_v0 = vld [vmem:[#allocation2] sm:$0xff]  ;;  %v42_v1 = vld [vmem:[#allocation2 + $0x8] sm:$0xff]  ;;  %s151_s6 = smov [#allocation7]  }
  0x27   :  { %v47_v2 = vld [vmem:[#allocation2 + $0x10] sm:$0xff]  ;;  %v43_v3 = vadd.f32 %v42_v1, %v38_v0  ;;  %v51_v4 = vld [vmem:[#allocation5] sm:$0xff]  ;;  %s60_s7 = sshll.u32 %s151_s6, 4  ;;  %s61_s7 = int_to_ptr.vmem [resolvable:$true] %s60_s7 }
  0x28   :  { %s119_s8 = scalar_lea.vmem %s61_s7, 128  ;;  %p124_p3 = scmp.lt.s32.totalorder %s61_s7, %s61_s7 }
  0x29   :  { %v48_v5 = vadd.f32 %v47_v2, %v43_v3  ;;  %p120_p2 = scmp.ne.s32.totalorder %s61_s7, %s119_s8  ;;  %p125_p4 = scmp.lt.s32.totalorder %s119_s8, %s119_s8 }
  0x2b   :  { %v52_v6 = vmul.f32 %v51_v4, %v48_v5  ;;  %p126_p5 = por %p125_p4, %p124_p3 }
  0x2d   :  { %53 = vst [vmem:[#allocation7] sm:$0xff] %v52_v6  ;;  %p127_p6 = pnand %p126_p5, %p120_p2 }
  0x2f   :  { %130 = shalt.err (!%p127_p6)
}
  0x30   :  { %s131_s10 = scalar_lea.hbm %s205_s2, 128 }
  0x31   :  { %p132_p7 = scmp.ne.s32.totalorder %s205_s2, %s131_s10  ;;  %p135_p8 = scmp.lt.u32.totalorder %s131_s10, %s205_s2 }
  0x33   :  { %p137_p9 = pnand %p135_p8, %p132_p7 }
  0x35   :  { %140 = shalt.err (!%p137_p9)
}
  0x36   :  { %63 = dma.vmem_to_hbm [thread:$0]  %s61_s7, 128, %s205_s2, [#allocation4]  }
  0x37   :  { %145 = dma.done.wait [#allocation4], 128  }
  0x38   :  { %146 = vsyncadd [#allocation4], 4294967168 }
  0x39   :  { %67 = vsyncpa [#allocation3], 1 }
  0x3a   :  { %68 = vsyncpa [#allocation6], 1 }
  0x3b   :  { %69 = vsyncpa [#allocation4], 1 }

</bundles_post_ra>
